<compile_context>
chip_gen: v7x
topology: tpu7x:2x2x1
jax: 0.10.0
libtpu: 0.0.40
codegen_flags: <defaults>
</compile_context>

<pallas_src>
import functools
import math

import jax
import jax.numpy as jnp
from jax import lax
from jax.experimental import pallas as pl
from jax.experimental.pallas import tpu as pltpu


_VMEM_LIMIT = 32 * 1024 * 1024  # safe on v5e/v6e (128 MiB phys) and v7x (64 MiB)


def _round_up(x, m):
    return ((x + m - 1) // m) * m


def _dot(a, b):
    # f32 MXU matmul with full-precision decomposition + f32 accumulation.
    return jnp.dot(a, b, precision=jax.lax.Precision.HIGHEST,
                   preferred_element_type=jnp.float32)


# ---------------------------------------------------------------------------
# Kernels
# ---------------------------------------------------------------------------
def _project_kernel(x_ref, w_ref, o_ref):
    """o = relu(x @ w) -- row-tiled, no bias (project_node_in_feats)."""
    o_ref[...] = jnp.maximum(_dot(x_ref[...], w_ref[...]), 0.0)


def _wln_layer_kernel(h_ref, e_ref, src_ref, dstT_ref,
                      w_msg_h_ref, w_msg_e_ref, b_msg_ref,
                      w_new_h_ref, w_new_v_ref, b_new_ref,
                      out_ref, hv_acc):
    """One fused WLN message-passing layer; grid axis = edge tiles (reduction)."""
    t = pl.program_id(0)
    v_pad = h_ref.shape[0]
    te = e_ref.shape[0]

    @pl.when(t == 0)
    def _init():
        hv_acc[...] = jnp.zeros_like(hv_acc)

    h = h_ref[...]

    # Gather h[src] for this edge tile. One-hot selector is built in vregs
    # from an iota (padded edges carry index -1 -> all-zero row), never in HBM.
    src_col = src_ref[...]                                        # (te, 1) i32
    gather_oh = (lax.broadcasted_iota(jnp.int32, (te, v_pad), 1) == src_col
                 ).astype(jnp.float32)
    he_src = _dot(gather_oh, h)                                   # (te, F)

    # project_concatenated_messages, concat replaced by K-split matmuls.
    msg = _dot(he_src, w_msg_h_ref[...])
    msg = msg + _dot(e_ref[...], w_msg_e_ref[...])
    msg = jnp.maximum(msg + b_msg_ref[...], 0.0)

    # Scatter-add messages to destination nodes; accumulator stays in VMEM,
    # output (V_pad, 128) is lane-dense. Padded edges (dst == -1) hit no row.
    dst_row = dstT_ref[...]                                       # (1, te) i32
    scatter_oh = (lax.broadcasted_iota(jnp.int32, (v_pad, te), 0) == dst_row
                  ).astype(jnp.float32)
    hv_acc[...] += _dot(scatter_oh, msg)

    # get_new_node_feats fused in at the last edge tile (weight-split concat).
    @pl.when(t == pl.num_programs(0) - 1)
    def _finish():
        new = _dot(h, w_new_h_ref[...]) + _dot(hv_acc[...], w_new_v_ref[...])
        out_ref[...] = jnp.maximum(new + b_new_ref[...], 0.0)


def _wln_setcomp_kernel(h_ref, e_ref, src_ref, dstT_ref,
                        w_node_ref, w_edge_ref, w_self_ref,
                        out_ref, hv_ref, nbr_acc):
    """Fused set-comparison: hv=hW_node; sum_e hv[src]*eW_edge -> * (hW_self)."""
    t = pl.program_id(0)
    v_pad = h_ref.shape[0]
    te = e_ref.shape[0]

    @pl.when(t == 0)
    def _init():
        hv_ref[...] = _dot(h_ref[...], w_node_ref[...])
        nbr_acc[...] = jnp.zeros_like(nbr_acc)

    src_col = src_ref[...]
    gather_oh = (lax.broadcasted_iota(jnp.int32, (te, v_pad), 1) == src_col
                 ).astype(jnp.float32)
    hv_src = _dot(gather_oh, hv_ref[...])                         # hv[src]

    he = _dot(e_ref[...], w_edge_ref[...])
    m = hv_src * he                                               # u_mul_e (fused)

    dst_row = dstT_ref[...]
    scatter_oh = (lax.broadcasted_iota(jnp.int32, (v_pad, te), 0) == dst_row
                  ).astype(jnp.float32)
    nbr_acc[...] += _dot(scatter_oh, m)

    @pl.when(t == pl.num_programs(0) - 1)
    def _finish():
        h_self = _dot(h_ref[...], w_self_ref[...])
        out_ref[...] = nbr_acc[...] * h_self                      # fused product


# ---------------------------------------------------------------------------
# pallas_call wrappers
# ---------------------------------------------------------------------------
def project_node_in(node_feats, w_in, *, row_tile):
    v_pad, k = node_feats.shape
    _, f = w_in.shape
    return pl.pallas_call(
        _project_kernel,
        out_shape=jax.ShapeDtypeStruct((v_pad, f), jnp.float32),
        grid=(v_pad // row_tile,),
        in_specs=[pl.BlockSpec((row_tile, k), lambda i: (i, 0)),
                  pl.BlockSpec((k, f), lambda i: (0, 0))],
        out_specs=pl.BlockSpec((row_tile, f), lambda i: (i, 0)),
        compiler_params=pltpu.CompilerParams(
            dimension_semantics=("parallel",),
            vmem_limit_bytes=_VMEM_LIMIT),
    )(node_feats, w_in)


def _edge_reduction_call(kernel, h, edge_feats, src_col, dst_row, weights,
                         n_scratch, *, edge_tile):
    v_pad, f = h.shape
    e_pad, fe = edge_feats.shape
    n_tiles = e_pad // edge_tile
    const = lambda t: (0, 0)

    in_specs = [
        pl.BlockSpec((v_pad, f), const),                 # h, resident in VMEM
        pl.BlockSpec((edge_tile, fe), lambda t: (t, 0)),  # edge-feature tile
        pl.BlockSpec((edge_tile, 1), lambda t: (t, 0)),   # src indices (col)
        pl.BlockSpec((1, edge_tile), lambda t: (0, t)),   # dst indices (row)
    ]
    for w in weights:
        in_specs.append(pl.BlockSpec(w.shape, const))

    return pl.pallas_call(
        kernel,
        out_shape=jax.ShapeDtypeStruct((v_pad, f), jnp.float32),
        grid=(n_tiles,),
        in_specs=in_specs,
        out_specs=pl.BlockSpec((v_pad, f), const),
        scratch_shapes=[pltpu.VMEM((v_pad, f), jnp.float32)] * n_scratch,
        compiler_params=pltpu.CompilerParams(
            dimension_semantics=("arbitrary",),          # edge axis = reduction
            vmem_limit_bytes=_VMEM_LIMIT),
    )(h, edge_feats, src_col, dst_row, *weights)


def wln_layer(h, edge_feats, src_col, dst_row, p, *, edge_tile):
    weights = (p["w_msg_h"], p["w_msg_e"], p["b_msg"],
               p["w_new_h"], p["w_new_v"], p["b_new"])
    return _edge_reduction_call(_wln_layer_kernel, h, edge_feats, src_col,
                                dst_row, weights, 1, edge_tile=edge_tile)


def wln_set_comparison(h, edge_feats, src_col, dst_row, p, *, edge_tile):
    weights = (p["w_node"], p["w_edge"], p["w_self"])
    return _edge_reduction_call(_wln_setcomp_kernel, h, edge_feats, src_col,
                                dst_row, weights, 2, edge_tile=edge_tile)


# ---------------------------------------------------------------------------
# Parameters (WLNLinear init: weight ~ N(0, min(1/sqrt(in), 0.1)), bias = 0).
# Concatenated weights are stored pre-split (K-split form) as (in, out).
# ---------------------------------------------------------------------------
def init_wln_params(key, node_in, edge_in, node_out):
    ks = jax.random.split(key, 8)

    def norm(k, shape, std):
        return std * jax.random.normal(k, shape, dtype=jnp.float32)

    std_in = min(1.0 / math.sqrt(node_in), 0.1)
    std_msg = min(1.0 / math.sqrt(edge_in + node_out), 0.1)
    std_new = min(1.0 / math.sqrt(2 * node_out), 0.1)
    std_edge = min(1.0 / math.sqrt(edge_in), 0.1)
    std_node = min(1.0 / math.sqrt(node_out), 0.1)

    return dict(
        w_in=norm(ks[0], (node_in, node_out), std_in),
        w_msg_h=norm(ks[1], (node_out, node_out), std_msg),
        w_msg_e=norm(ks[2], (edge_in, node_out), std_msg),
        b_msg=jnp.zeros((1, node_out), jnp.float32),
        w_new_h=norm(ks[3], (node_out, node_out), std_new),
        w_new_v=norm(ks[4], (node_out, node_out), std_new),
        b_new=jnp.zeros((1, node_out), jnp.float32),
        w_edge=norm(ks[5], (edge_in, node_out), std_edge),
        w_node=norm(ks[6], (node_out, node_out), std_node),
        w_self=norm(ks[7], (node_out, node_out), std_node),
    )


# ---------------------------------------------------------------------------
# Forward pass (project_in_feats=True, set_comparison=True, num_edges > 0)
# ---------------------------------------------------------------------------
def wln_forward(params, src, dst, node_feats, edge_feats, num_nodes,
                n_layers=3, edge_tile=128, node_row_tile=64):
    V = int(num_nodes)
    E = int(src.shape[0])
    node_in = node_feats.shape[1]
    edge_in = edge_feats.shape[1]

    v_pad = _round_up(max(V, node_row_tile), node_row_tile)
    e_pad = _round_up(max(E, edge_tile), edge_tile)

    # Host-side padding (graph glue). Padded edges get index -1 so they match
    # no node in the in-kernel one-hot selectors and contribute nothing.
    nf = jnp.zeros((v_pad, node_in), jnp.float32).at[:V].set(
        node_feats.astype(jnp.float32))
    ef = jnp.zeros((e_pad, edge_in), jnp.float32).at[:E].set(
        edge_feats.astype(jnp.float32))
    src_col = jnp.full((e_pad, 1), -1, jnp.int32).at[:E, 0].set(
        src.astype(jnp.int32))
    dst_row = jnp.full((1, e_pad), -1, jnp.int32).at[0, :E].set(
        dst.astype(jnp.int32))

    h = project_node_in(nf, params["w_in"], row_tile=node_row_tile)
    for _ in range(n_layers):
        h = wln_layer(h, ef, src_col, dst_row, params, edge_tile=edge_tile)
    out = wln_set_comparison(h, ef, src_col, dst_row, params,
                             edge_tile=edge_tile)
    return out[:V]


# ---------------------------------------------------------------------------
# Pure-JAX reference (uses the concatenated-weight formulation + segment sums)
# ---------------------------------------------------------------------------
def wln_reference(params, src, dst, node_feats, edge_feats, num_nodes,
                  n_layers=3):
    hp = jax.lax.Precision.HIGHEST
    w_msg = jnp.concatenate([params["w_msg_h"], params["w_msg_e"]], axis=0)
    w_new = jnp.concatenate([params["w_new_h"], params["w_new_v"]], axis=0)

    h = jnp.maximum(jnp.dot(node_feats, params["w_in"], precision=hp), 0.0)
    for _ in range(n_layers):
        cat = jnp.concatenate([h[src], edge_feats], axis=1)
        he = jnp.maximum(jnp.dot(cat, w_msg, precision=hp) + params["b_msg"],
                         0.0)
        hv_new = jnp.zeros((num_nodes, he.shape[1]), he.dtype).at[dst].add(he)
        h = jnp.maximum(
            jnp.dot(jnp.concatenate([h, hv_new], axis=1), w_new, precision=hp)
            + params["b_new"], 0.0)

    hv = jnp.dot(h, params["w_node"], precision=hp)
    he = jnp.dot(edge_feats, params["w_edge"], precision=hp)
    m = hv[src] * he
    h_nbr = jnp.zeros((num_nodes, m.shape[1]), m.dtype).at[dst].add(m)
    h_self = jnp.dot(h, params["w_self"], precision=hp)
    return h_nbr * h_self


if __name__ == "__main__":
    V, E = 192, 384
    NODE_IN, EDGE_IN, NODE_OUT = 16, 16, 128
    N_LAYERS = 3

    key = jax.random.PRNGKey(0)
    k_nf, k_ef, k_src, k_dst, k_p = jax.random.split(key, 5)
    node_feats = jax.random.normal(k_nf, (V, NODE_IN), dtype=jnp.float32)
    edge_feats = jax.random.normal(k_ef, (E, EDGE_IN), dtype=jnp.float32)
    src = jax.random.randint(k_src, (E,), 0, V, dtype=jnp.int32)
    dst = jax.random.randint(k_dst, (E,), 0, V, dtype=jnp.int32)

    params = init_wln_params(k_p, NODE_IN, EDGE_IN, NODE_OUT)

    out = wln_forward(params, src, dst, node_feats, edge_feats, V,
                      n_layers=N_LAYERS)
    out = jax.block_until_ready(out)

    ref = jax.block_until_ready(
        wln_reference(params, src, dst, node_feats, edge_feats, V,
                      n_layers=N_LAYERS))

    assert out.shape == (V, NODE_OUT), out.shape
    assert jnp.allclose(out, ref, atol=2e-3, rtol=2e-3), (
        "mismatch vs reference, max abs err = %g"
        % float(jnp.max(jnp.abs(out - ref))))

    print("KERNEL_OK")
</pallas_src>

<mosaic_0001>
module attributes {stable_mosaic.version = 11 : i64} {
  func.func @_project_kernel(%arg0: i32, %arg1: memref<64x16xf32, #tpu.memory_space<vmem>>, %arg2: memref<16x128xf32, #tpu.memory_space<vmem>>, %arg3: memref<64x128xf32, #tpu.memory_space<vmem>>) attributes {dimension_semantics = [#tpu.dimension_semantics<parallel>], iteration_bounds = array<i64: 3>, scalar_prefetch = 0 : i64, scratch_operands = 0 : i64, tpu.core_type = #tpu.core_type<tc>, window_params = [{transform_indices = @transform_0, window_bounds = array<i64: 64, 16>}, {pipeline_mode = #tpu.pipeline_mode<synchronous>, transform_indices = @transform_1, window_bounds = array<i64: 16, 128>}, {transform_indices = @transform_2, window_bounds = array<i64: 64, 128>}]} {
    %c0 = arith.constant 0 : index
    %c0_0 = arith.constant 0 : index
    %0 = vector.load %arg1[%c0, %c0_0] : memref<64x16xf32, #tpu.memory_space<vmem>>, vector<64x16xf32>
    %c0_1 = arith.constant 0 : index
    %c0_2 = arith.constant 0 : index
    %1 = vector.load %arg2[%c0_1, %c0_2] : memref<16x128xf32, #tpu.memory_space<vmem>>, vector<16x128xf32>
    %cst = arith.constant dense<0.000000e+00> : vector<64x128xf32>
    %2 = tpu.matmul %0, %1, %cst {dimension_numbers = #tpu.dot_dimension_numbers<[1], [0], [0], [1], [0, 0, 1, 1], [], []>, precision = #tpu.contract_precision<fp32>} : vector<64x16xf32>, vector<16x128xf32>, vector<64x128xf32> -> vector<64x128xf32>
    %cst_3 = arith.constant 0.000000e+00 : f32
    %3 = vector.broadcast %cst_3 : f32 to vector<64x128xf32>
    %4 = arith.maximumf %2, %3 : vector<64x128xf32>
    %c0_4 = arith.constant 0 : index
    %c0_5 = arith.constant 0 : index
    %5 = vector.load %arg3[%c0_4, %c0_5] : memref<64x128xf32, #tpu.memory_space<vmem>>, vector<64x128xf32>
    tpu.vector_store %arg3[%c0_4, %c0_5], %4 {strides = array<i32>} : memref<64x128xf32, #tpu.memory_space<vmem>>, vector<64x128xf32>,
    return
  }
  func.func @transform_0(%arg0: i32) -> (i32, i32) {
    %c0_i32 = arith.constant 0 : i32
    %c0_i32_0 = arith.constant 0 : i32
    return %arg0, %c0_i32 : i32, i32
  }
  func.func @transform_1(%arg0: i32) -> (i32, i32) {
    %c0_i32 = arith.constant 0 : i32
    %c0_i32_0 = arith.constant 0 : i32
    %c0_i32_1 = arith.constant 0 : i32
    return %c0_i32, %c0_i32_0 : i32, i32
  }
  func.func @transform_2(%arg0: i32) -> (i32, i32) {
    %c0_i32 = arith.constant 0 : i32
    %c0_i32_0 = arith.constant 0 : i32
    return %arg0, %c0_i32 : i32, i32
  }
}

</mosaic_0001>

<bundles_post_ra>
// kernel: tpu_custom_call.1
= control target key start
LH: loop header
LB: loop body
LE: loop exit
PB: predicated region body
PF: predicated region fallthrough
CT: control target
= control target key end

     0   :  { %7 = vsyncpa [#allocation3], 0  ;;  %s1620_s0 = inlined_call_operand.vmem [shape: f32[192,16], index: 0, kind: input, shape index: {}]   ;;  %s1621_s1 = inlined_call_operand.vmem [shape: f32[16,128], index: 1, kind: input, shape index: {}]   ;;  %s1622_s2 = inlined_call_operand.hbm [shape: f32[192,128], index: 2, kind: output, shape index: {}]  }
   0x1   :  { %9 = vsyncpa [#allocation3 + $0x1], 0  ;;  %s1388_s9 = smov 0   ;;  %s1390_s10 = smov 0  }
   0x2   :  { %s1392_s11 = smov 0   ;;  %s1394_s12 = smov 0  }
   0x3 LB: > { %s1409_s13 = sadd.s32 4294967295, %s1368_s12   ;;  %s1032_s14 = sadd.s32 4294967294, %s1368_s12   ;;  %s1368_s12 = sphi %s1394_s12, %s1628_s12   ;;  %s1364_s11 = sphi %s1392_s11, %s1627_s11   ;;  %s1360_s10 = sphi %s1390_s10, %s1626_s10   ;;  %s1356_s9 = sphi %s1388_s9, %s1625_s9  }
   0x4   : > { %s1413_s15 = sadd.s32 1, %s1368_s12   ;;  %s69_s16 = sadd.s32 1, %s1364_s11 }
   0x5   : > { %s66_s17 = ssub.s32 %s1368_s12, %s1413_s15  ;;  %p79_p0 = scmp.ne.s32.totalorder %s1364_s11, %s1360_s10 }
   0x6   : > { %p67_p1 = scmp.eq.s32.totalorder %s66_s17, 0  ;;  %p80_p2 = scmp.eq.s32.totalorder %s1409_s13, 2 }
   0x7   : > { %p85_p3 = scmp.ne.s32.totalorder %s1360_s10, %s1356_s9  ;;  %p86_p4 = scmp.eq.s32.totalorder %s1032_s14, 2 }
   0x8   : > { %s1424_s18 = scalar_select %p67_p1, %s1364_s11, %s69_s16  }
   0x9   : > { %p1426_p5 = por %p80_p2, %p79_p0  ;;  %p1430_p6 = por %p86_p4, %p85_p3 }
   0xa   : > { %p1035_p7 = scmp.ge.s32.totalorder %s1368_s12, 1  ;;  %p116_p8 = scmp.lt.s32.totalorder %s1368_s12, 4 }
   0xc   : > { %p117_p9 = pnand %p1035_p7, %p116_p8 }
   0xd   : > { %v153_v0 = vld [vmem:[%s1621_s1] sm:$0xff] (!%p117_p9)  ;;  %v154_v1 = vld [vmem:[%s1621_s1 + $0x8] sm:$0xff] (!%p117_p9)  ;;  %s1037_s25 = sshll.u32 (!%p117_p9), %s1409_s13, 3  ;;  %vm155_vm0 = vcmask (!%p117_p9), 130048   ;;  %s135_s30 = sand.u32 (!%p117_p9), 1, %s1360_s10  }
   0xe   : > { %120 = sbr.rel (%p117_p9) target bundleno = 313 (0x139), region = 28  ;;  %v181_v2 = vand.u32 (!%p117_p9), 4294901760, %v153_v0  ;;  %v184_v3 = vand.u32 (!%p117_p9), 4294901760, %v154_v1  ;;  %p139_p10 = scmp.lt.s32.totalorder (!%p117_p9), %s1037_s25, 23 }
   0xf   : > { %s1036_s3 = sshll.u32 (!%p117_p9), %s135_s30, 6  ;;  %s1044_s5 = sshll.u32 (!%p117_p9), %s1409_s13, 10 }
  0x10   : > { %v1443_v4 = vpack.c.bf16 (!%p117_p9), %v184_v3, %v181_v2  ;;  %v1445_v5 = vsub.f32 (!%p117_p9), %v153_v0, %v181_v2  ;;  %v1447_v6 = vsub.f32 (!%p117_p9), %v154_v1, %v184_v3  ;;  %s1558_s4 = scalar_lea.vmem (!%p117_p9), [#allocation2], %s1036_s3  ;;  %s1571_s14 = scalar_lea.hbm (!%p117_p9), %s1622_s2, %s1044_s5 }
  0x11   : > { %s970_s6 = sshll.u32 (!%p117_p9), %s1558_s4, 4  ;;  %s1579_s13 = scalar_lea.sflag (!%p117_p9), [#allocation3], %s135_s30  ;;  %s1573_s6 = int_to_ptr.vmem [resolvable:$true] %s970_s6 }
  0x12   : > { %1214 = vmatprep.subr.bf16.mxu0 (!%p117_p9), %v1443_v4  ;;  %1202 = vmatprep.subr.bf16.mxu1 (!%p117_p9), %v1443_v4  ;;  %v330_v7 = vand.u32 (!%p117_p9), 4294901760, %v1445_v5  ;;  %v337_v8 = vand.u32 (!%p117_p9), 4294901760, %v1447_v6  ;;  %v1209_v62 = vpack.c.bf16 (!%p117_p9), %v1447_v6, %v1445_v5  ;;  %s1306_s16 = scalar_lea.vmem (!%p117_p9), %s1573_s6, 1024  ;;  %s1370_s17 = smov (!%p117_p9), [#allocation2]  }
  0x13   : > { %1216 = vmatpush3.bf16.msra.mxu0 (!%p117_p9), %v1443_v4  ;;  %1204 = vmatpush3.bf16.msra.mxu1 (!%p117_p9), %v1443_v4  ;;  %p1307_p11 = scmp.ne.s32.totalorder (!%p117_p9), %s1573_s6, %s1306_s16  ;;  %s1310_s21 = sshll.u32 (!%p117_p9), %s1370_s17, 4  ;;  %s1311_s21 = int_to_ptr.vmem [resolvable:$false] %s1310_s21 }
  0x14   : > { %v331_v11 = vsub.f32 (!%p117_p9), %v1445_v5, %v330_v7  ;;  %v338_v12 = vsub.f32 (!%p117_p9), %v1447_v6, %v337_v8  ;;  %v1217_v14 = vpack.c.bf16 (!%p117_p9), %v337_v8, %v330_v7  ;;  %s1312_s22 = scalar_lea.vmem (!%p117_p9), %s1311_s21, 2048  ;;  %p1313_p0 = scmp.lt.s32.totalorder (!%p117_p9), %s1573_s6, %s1311_s21 }
  0x15   : > { %s1630_s25 = smov (!%p139_p10, %s1037_s25), 23  ;;  %p1308_p12 = pnand %p1307_p11, %p1426_p5 }
  0x16   : > { %s1038_s26 = sshll.u32 %s1630_s25, 3  ;;  %v332_v23 = vand.u32 4294901760, %v331_v11  ;;  %v339_v24 = vand.u32 4294901760, %v338_v12  ;;  %1218 = vmatprep.subr.bf16.mxu0 %v1217_v14  ;;  %p1314_p1 = scmp.lt.s32.totalorder %s1312_s22, %s1306_s16 }
  0x17   : > { %s142_s29 = scalar_lea.vmem %s1620_s0, %s1038_s26  ;;  %p1309_p13 = pneg %p1308_p12 }
  0x18   : > { %v145_v9 = vld [vmem:[%s142_s29] sm:$0xff]  ;;  %v146_v10 = vld [vmem:[%s142_s29 + $0x8] sm:$0xff]  ;;  %v147_v13 = vld [vmem:[%s142_s29 + $0x10] sm:$0xff]  ;;  %v1205_v32 = vpack.c.bf16 %v339_v24, %v332_v23  ;;  %p1315_p2 = por %p1314_p1, %p1313_p0 }
  0x19   : > { %v157_v15 = vsel %vm155_vm0, %v145_v9, 0  ;;  %v160_v16 = vsel %vm155_vm0, %v146_v10, 0  ;;  %v163_v17 = vsel %vm155_vm0, %v147_v13, 0  ;;  %v148_v18 = vld [vmem:[%s142_s29 + $0x18] sm:$0xff]  ;;  %v149_v19 = vld [vmem:[%s142_s29 + $0x20] sm:$0xff]  ;;  %v150_v20 = vld [vmem:[%s142_s29 + $0x28] sm:$0xff] }
  0x1a   : > { %v1463_v21 = vand.u32 4294901760, %v157_v15  ;;  %v1465_v22 = vand.u32 4294901760, %v160_v16  ;;  %v151_v25 = vld [vmem:[%s142_s29 + $0x30] sm:$0xff]  ;;  %v1467_v26 = vand.u32 4294901760, %v163_v17  ;;  %v166_v27 = vsel %vm155_vm0, %v148_v18, 0  ;;  %v152_v34 = vld [vmem:[%s142_s29 + $0x38] sm:$0xff]  ;;  %1206 = vmatprep.subr.bf16.mxu1 %v1205_v32  ;;  %p1316_p3 = pnand %p1315_p2, %p1309_p13 }
  0x1b   : > { %v169_v28 = vsel %vm155_vm0, %v149_v19, 0  ;;  %v172_v29 = vsel %vm155_vm0, %v150_v20, 0  ;;  %v1478_v33 = vand.u32 4294901760, %v166_v27  ;;  %v175_v38 = vsel %vm155_vm0, %v151_v25, 0 }
  0x1c   : > { %v1473_v30 = vsub.f32 %v157_v15, %v1463_v21  ;;  %v1476_v31 = vsub.f32 %v160_v16, %v1465_v22  ;;  %v1481_v35 = vsub.f32 %v163_v17, %v1467_v26  ;;  %v1483_v36 = vand.u32 4294901760, %v169_v28 }
  0x1d   : > { %v1485_v37 = vand.u32 4294901760, %v172_v29  ;;  %v1491_v41 = vsub.f32 %v166_v27, %v1478_v33  ;;  %v1493_v42 = vand.u32 4294901760, %v175_v38  ;;  %v178_v46 = vsel %vm155_vm0, %v152_v34, 0 }
  0x1e   : > { %v249_v39 = vand.u32 4294901760, %v1473_v30  ;;  %v259_v40 = vand.u32 4294901760, %v1476_v31  ;;  %v269_v43 = vand.u32 4294901760, %v1481_v35  ;;  %v1497_v44 = vsub.f32 %v169_v28, %v1483_v36 }
  0x1f   : > { %v1500_v45 = vsub.f32 %v172_v29, %v1485_v37  ;;  %v279_v49 = vand.u32 4294901760, %v1491_v41  ;;  %v1507_v50 = vsub.f32 %v175_v38, %v1493_v42  ;;  %v1512_v54 = vand.u32 4294901760, %v178_v46 }
  0x20   : > { %1157 = vmatprep.mubr.f32.mxu0 %v249_v39  ;;  %v250_v47 = vsub.f32 %v1473_v30, %v249_v39  ;;  %v260_v48 = vsub.f32 %v1476_v31, %v259_v40  ;;  %v270_v51 = vsub.f32 %v1481_v35, %v269_v43  ;;  %v289_v52 = vand.u32 4294901760, %v1497_v44 }
  0x21   : > { %1158 = vmatmul.mubr.f32.vlgmr.msra.gmra.mrb[0].mxu0 %v259_v40  ;;  %v299_v53 = vand.u32 4294901760, %v1500_v45  ;;  %v280_v57 = vsub.f32 %v1491_v41, %v279_v49  ;;  %v309_v58 = vand.u32 4294901760, %v1507_v50  ;;  %v318_v61 = vsub.f32 %v178_v46, %v1512_v54 }
  0x22   : > { %v251_v55 = vand.u32 4294901760, %v250_v47  ;;  %1160 = vmatprep.mubr.f32.mxu0 %v269_v43  ;;  %v261_v56 = vand.u32 4294901760, %v260_v48  ;;  %1220 = vmatpush3.bf16.msra.mxu0 %v1217_v14  ;;  %v271_v59 = vand.u32 4294901760, %v270_v51  ;;  %v290_v60 = vsub.f32 %v1497_v44, %v289_v52 }
  0x23   : > { %1222 = vmatprep.subr.bf16.mxu0 %v1443_v4  ;;  %v281_v63 = vand.u32 4294901760, %v280_v57  ;;  %v300_v0 = vsub.f32 %v1500_v45, %v299_v53  ;;  %v319_v1 = vand.u32 4294901760, %v318_v61  ;;  %v310_v3 = vsub.f32 %v1507_v50, %v309_v58 }
  0x24   : > { %1109 = vmatprep.mubr.f32.mxu1 %v251_v55  ;;  %v291_v2 = vand.u32 4294901760, %v290_v60 }
  0x25   : > { %1110 = vmatmul.mubr.f32.vlgmr.msra.gmra.mrb[0].mxu1 %v261_v56  ;;  %1161 = vmatmul.mubr.f32.gmra.mrb[2].mxu0 %v279_v49  ;;  %v301_v7 = vand.u32 4294901760, %v300_v0  ;;  %v320_v5 = vsub.f32 %v318_v61, %v319_v1  ;;  %v311_v6 = vand.u32 4294901760, %v310_v3 }
  0x26   : > { %1208 = vmatpush3.bf16.msra.mxu1 %v1205_v32  ;;  %1112 = vmatprep.mubr.f32.mxu1 %v271_v59 }
  0x27   : > { %1163 = vmatprep.mubr.f32.mxu0 %v289_v52  ;;  %1210 = vmatprep.subr.bf16.mxu1 %v1209_v62  ;;  %v321_v8 = vand.u32 4294901760, %v320_v5 }
  0x29   : > { %1113 = vmatmul.mubr.f32.gmra.mrb[2].mxu1 %v281_v63  ;;  %1164 = vmatmul.mubr.f32.gmra.mrb[4].mxu0 %v299_v53 }
  0x2a   : > { %1115 = vmatprep.mubr.f32.mxu1 %v291_v2  ;;  %1166 = vmatprep.mubr.f32.mxu0 %v309_v58 }
  0x2d   : > { %1116 = vmatmul.mubr.f32.gmra.mrb[4].mxu1 %v301_v7  ;;  %1167 = vmatmul.mubr.f32.gmra.mrb[6].mxu0 %v319_v1 }
  0x2e   : > { %1118 = vmatprep.mubr.f32.mxu1 %v311_v6  ;;  %1173 = vmatprep.mubr.f32.mxu0 %v1463_v21 }
  0x31   : > { %1119 = vmatmul.mubr.f32.gmra.mrb[6].mxu1 %v321_v8  ;;  %1174 = vmatmul.mubr.f32.vlgmr.msra.gmra.mrb[0].mxu0 %v1465_v22 }
  0x32   : > { %1125 = vmatprep.mubr.f32.mxu1 %v1463_v21  ;;  %1176 = vmatprep.mubr.f32.mxu0 %v1467_v26 }
  0x33   : > { %1224 = vmatpush3.bf16.msra.mxu0 %v1443_v4 }
  0x35   : > { %1126 = vmatmul.mubr.f32.vlgmr.msra.gmra.mrb[0].mxu1 %v1465_v22  ;;  %1177 = vmatmul.mubr.f32.gmra.mrb[2].mxu0 %v1478_v33 }
  0x36   : > { %1212 = vmatpush3.bf16.msra.mxu1 %v1209_v62  ;;  %1128 = vmatprep.mubr.f32.mxu1 %v1467_v26 }
  0x37   : > { %1179 = vmatprep.mubr.f32.mxu0 %v1483_v36 }
  0x39   : > { %1129 = vmatmul.mubr.f32.gmra.mrb[2].mxu1 %v1478_v33  ;;  %1180 = vmatmul.mubr.f32.gmra.mrb[4].mxu0 %v1485_v37 }
  0x3a   : > { %1131 = vmatprep.mubr.f32.mxu1 %v1483_v36  ;;  %1182 = vmatprep.mubr.f32.mxu0 %v1493_v42 }
  0x3d   : > { %1132 = vmatmul.mubr.f32.gmra.mrb[4].mxu1 %v1485_v37  ;;  %1183 = vmatmul.mubr.f32.gmra.mrb[6].mxu0 %v1512_v54 }
  0x3e   : > { %1134 = vmatprep.mubr.f32.mxu1 %v1493_v42  ;;  %1189 = vmatprep.mubr.f32.mxu0 %v1463_v21 }
  0x41   : > { %1135 = vmatmul.mubr.f32.gmra.mrb[6].mxu1 %v1512_v54  ;;  %1190 = vmatmul.mubr.f32.vlgmr.msra.gmra.mrb[0].mxu0 %v1465_v22 }
  0x42   : > { %1141 = vmatprep.mubr.f32.mxu1 %v1473_v30  ;;  %1192 = vmatprep.mubr.f32.mxu0 %v1467_v26 }
  0x45   : > { %1142 = vmatmul.mubr.f32.vlgmr.msra.gmra.mrb[0].mxu1 %v1476_v31  ;;  %1193 = vmatmul.mubr.f32.gmra.mrb[2].mxu0 %v1478_v33 }
  0x46   : > { %1144 = vmatprep.mubr.f32.mxu1 %v1481_v35  ;;  %1195 = vmatprep.mubr.f32.mxu0 %v1483_v36 }
  0x49   : > { %1145 = vmatmul.mubr.f32.gmra.mrb[2].mxu1 %v1491_v41  ;;  %1196 = vmatmul.mubr.f32.gmra.mrb[4].mxu0 %v1485_v37 }
  0x4a   : > { %1147 = vmatprep.mubr.f32.mxu1 %v1497_v44  ;;  %1198 = vmatprep.mubr.f32.mxu0 %v1493_v42 }
  0x4d   : > { %1148 = vmatmul.mubr.f32.gmra.mrb[4].mxu1 %v1500_v45  ;;  %1199 = vmatmul.mubr.f32.gmra.mrb[6].mxu0 %v1512_v54 }
  0x4e   : > { %1150 = vmatprep.mubr.f32.mxu1 %v1507_v50 }
  0x51   : > { %1151 = vmatmul.mubr.f32.gmra.mrb[6].mxu1 %v318_v61 }
 0x114   : > { %v1191_v4 = vpop.f32.mrb[0].mxu0 }
 0x115   : > { %v894_v9 = vpop.f32.mrb[1].mxu0 }
 0x118   : > { %v1143_v10 = vpop.f32.mrb[0].mxu1  ;;  %v1194_v11 = vpop.f32.mrb[2].mxu0 }
 0x119   : > { %v1225_v12 = vadd.f32 %v1191_v4, %v1143_v10  ;;  %v522_v13 = vpop.f32.mrb[1].mxu1  ;;  %v906_v14 = vpop.f32.mrb[3].mxu0 }
 0x11a   : > { %v1226_v15 = vadd.f32 %v894_v9, %v522_v13 }
 0x11b   : > { %v941_v16 = vmax.f32 %v1225_v12, 0.0 }
 0x11c   : > { %v940_v17 = vmax.f32 %v1226_v15, 0.0  ;;  %v1146_v18 = vpop.f32.mrb[2].mxu1  ;;  %v1197_v19 = vpop.f32.mrb[4].mxu0 }
 0x11d   : > { %949 = vst [vmem:[%s1558_s4 + $0x8] sm:$0xff] %v941_v16  ;;  %v1227_v20 = vadd.f32 %v1194_v11, %v1146_v18  ;;  %v536_v21 = vpop.f32.mrb[3].mxu1  ;;  %v918_v22 = vpop.f32.mrb[5].mxu0 }
 0x11e   : > { %948 = vst [vmem:[%s1558_s4] sm:$0xff] %v940_v17  ;;  %v1228_v23 = vadd.f32 %v906_v14, %v536_v21 }
 0x11f   : > { %v943_v24 = vmax.f32 %v1227_v20, 0.0 }
 0x120   : > { %v942_v25 = vmax.f32 %v1228_v23, 0.0  ;;  %v1149_v26 = vpop.f32.mrb[4].mxu1  ;;  %v1200_v27 = vpop.f32.mrb[6].mxu0 }
 0x121   : > { %951 = vst [vmem:[%s1558_s4 + $0x18] sm:$0xff] %v943_v24  ;;  %v1229_v28 = vadd.f32 %v1197_v19, %v1149_v26  ;;  %v550_v29 = vpop.f32.mrb[5].mxu1  ;;  %v930_v30 = vpop.f32.mrb[7].mxu0 }
 0x122   : > { %950 = vst [vmem:[%s1558_s4 + $0x10] sm:$0xff] %v942_v25  ;;  %v1230_v31 = vadd.f32 %v918_v22, %v550_v29 }
 0x123   : > { %v945_v32 = vmax.f32 %v1229_v28, 0.0 }
 0x124   : > { %v944_v33 = vmax.f32 %v1230_v31, 0.0  ;;  %v1152_v34 = vpop.f32.mrb[6].mxu1 }
 0x125   : > { %953 = vst [vmem:[%s1558_s4 + $0x28] sm:$0xff] %v945_v32  ;;  %v1231_v35 = vadd.f32 %v1200_v27, %v1152_v34  ;;  %v564_v36 = vpop.f32.mrb[7].mxu1 }
 0x126   : > { %952 = vst [vmem:[%s1558_s4 + $0x20] sm:$0xff] %v944_v33  ;;  %v1232_v37 = vadd.f32 %v930_v30, %v564_v36 }
 0x127   : > { %v947_v38 = vmax.f32 %v1231_v35, 0.0 }
 0x128   : > { %v946_v39 = vmax.f32 %v1232_v37, 0.0 }
 0x129   : > { %955 = vst [vmem:[%s1558_s4 + $0x38] sm:$0xff] %v947_v38 }
 0x12a   : > { %954 = vst [vmem:[%s1558_s4 + $0x30] sm:$0xff] %v946_v39 }
 0x12b   : > { %1319 = shalt.err (!%p1316_p3)
}
 0x12c   : > { %s1320_s23 = scalar_lea.hbm %s1571_s14, 1024  ;;  %s1324_s26 = scalar_lea.hbm %s1622_s2, 3072 }
 0x12d   : > { %p1321_p4 = scmp.ne.s32.totalorder %s1571_s14, %s1320_s23  ;;  %p1325_p9 = scmp.lt.u32.totalorder %s1571_s14, %s1622_s2 }
 0x12e   : > { %p1326_p10 = scmp.lt.u32.totalorder %s1324_s26, %s1320_s23  ;;  %p1328_p12 = scmp.lt.u32.totalorder %s1320_s23, %s1571_s14 }
 0x12f   : > { %p1322_p7 = pnand %p1321_p4, %p1426_p5 }
 0x130   : > { %p1327_p11 = por %p1326_p10, %p1325_p9 }
 0x131   : > { %p1323_p8 = pneg %p1322_p7 }
 0x132   : > { %p1329_p13 = por %p1328_p12, %p1327_p11 }
 0x134   : > { %p1330_p0 = pnand %p1329_p13, %p1323_p8 }
 0x136   : > { %1333 = shalt.err (!%p1330_p0)
}
 0x137   : > { %s1371_s29 = smov 128   ;;  %s1372_s30 = smov 8  }
 0x138   : > { %1265 = dma.vmem_to_hbm [thread:$0]  (%p1426_p5), %s1573_s6, 1024, %s1571_s14, %s1579_s13, %s1371_s29, %s1371_s29, %s1372_s30  }
 0x139 PF: > { %p1271_p1 = scmp.ge.s32.totalorder %s1368_s12, 2  ;;  %s985_s3 = sand.u32 1, %s1356_s9  }
 0x13a   : > { %s986_s4 = scalar_lea.sflag [#allocation3], %s985_s3 }
 0x13b   : > { %p1268_p2 = pnand %p1271_p1, %p1430_p6 }
 0x13d   : > { %1351 = dma.done.wait (!%p1268_p2), %s986_s4, 1024  }
 0x13e   : > { %1353 = vsyncadd (!%p1268_p2), %s986_s4, 4294966272  ;;  %p12_p3 = scmp.ge.s32.totalorder %s1413_s15, 5   ;;  %s1625_s9 = smov %s1360_s10 }
 0x13f   : > { %s1626_s10 = smov %s1364_s11  ;;  %s1627_s11 = smov %s1424_s18 }
 0x140   : > { %s1628_s12 = smov %s1413_s15  ;;  %14 = sbr.rel (!%p12_p3) target bundleno = 3 (0x3), region = 63 }
 0x147   :  { %991 = vsyncpa [#allocation3], 1 }
 0x148   :  { %993 = vsyncpa [#allocation3 + $0x1], 1 }

</bundles_post_ra>
